<compile_context>
chip_gen: v7x
topology: tpu7x:2x2x1
jax: 0.10.0
libtpu: 0.0.40
codegen_flags: <defaults>
</compile_context>

<pallas_src>
import functools

import jax
import jax.numpy as jnp
from jax import lax
from jax.experimental import pallas as pl
from jax.experimental.pallas import tpu as pltpu


def _round_up(x, m):
    return ((x + m - 1) // m) * m


@functools.lru_cache(maxsize=None)
def _vmem_limit_bytes():
    """Generation-dependent scoped-VMEM limit (~75% of physical, capped)."""
    try:
        phys = int(pltpu.get_tpu_info().vmem_capacity_bytes)
    except Exception:
        phys = 64 << 20                        # conservative (v7x per-core size)
    return int(min(phys * 3 // 4, 100 << 20))  # ~96 MiB v5e/v6e, 48 MiB v7x


def prepare_params(w1, w2, *, max_v_tile=2048):
    """One-time weight prep, hoisted out of the forward path.

    Pads the frozen linear weights to lane-dense shapes and casts to bf16 once
    so the per-call forward does not re-read/re-write the weight matrices.
    Returns (w1_p, w2_p, v_tile).
    """
    E, H = w1.shape
    V = w2.shape[1]
    assert w2.shape[0] == H
    E_pad = _round_up(E, 128)
    H_pad = _round_up(H, 128)
    v_tile = min(_round_up(V, 128), max_v_tile)   # bounded V tile -> bounded VMEM
    V_pad = _round_up(V, v_tile)
    w1_p = jnp.zeros((E_pad, H_pad), jnp.bfloat16).at[:E, :H].set(
        w1.astype(jnp.bfloat16))
    w2_p = jnp.zeros((H_pad, V_pad), jnp.bfloat16).at[:H, :V].set(
        w2.astype(jnp.bfloat16))
    return w1_p, w2_p, v_tile


def cbow_kernel(x_ref, w1_ref, w2_ref, o_ref, h_sc, m_sc, l_sc, *,
                v_actual, v_pad):
    # Grid: (batch tile i, pass p, vocab tile j).
    #   pass 0: online running max / sum-exp over vocab tiles (flash-style).
    #   pass 1: recompute logits per tile, normalize, write probabilities.
    p = pl.program_id(1)
    j = pl.program_id(2)

    # First step of each batch tile: hidden layer + softmax-stat init.
    @pl.when((p == 0) & (j == 0))
    def _():
        h = jnp.dot(x_ref[...], w1_ref[...],
                    preferred_element_type=jnp.float32)        # (tb, H_pad) f32
        # TODO(synk): Dropout(p=0.2) is identity at inference; not applied here.
        h_sc[...] = h.astype(h_sc.dtype)
        m_sc[...] = jnp.full_like(m_sc, -jnp.inf)
        l_sc[...] = jnp.zeros_like(l_sc)

    # Logits for this vocab tile (computed in both passes), f32 MXU accumulate.
    logits = jnp.dot(h_sc[...], w2_ref[...],
                     preferred_element_type=jnp.float32)        # (tb, tv)

    if v_pad > v_actual:
        # Mask padded vocab columns (only the last tile has any, but the tile
        # index is dynamic so mask data-dependently).
        # TODO(synk): restrict the mask to the last V tile via pl.when + scratch.
        tv = logits.shape[-1]
        col = j * tv + lax.broadcasted_iota(jnp.int32, logits.shape, 1)
        logits = jnp.where(col < v_actual, logits, -jnp.inf)

    @pl.when(p == 0)
    def _():
        m_prev = m_sc[...]
        m_new = jnp.maximum(m_prev, jnp.max(logits, axis=-1, keepdims=True))
        l_sc[...] = (l_sc[...] * jnp.exp(m_prev - m_new)
                     + jnp.sum(jnp.exp(logits - m_new), axis=-1, keepdims=True))
        m_sc[...] = m_new

    @pl.when(p == 1)
    def _():
        inv_l = 1.0 / l_sc[...]           # exact normalization, tiny (tb, 1) op
        probs = jnp.exp(logits - m_sc[...]) * inv_l
        o_ref[...] = probs.astype(o_ref.dtype)


@functools.partial(
    jax.jit,
    static_argnames=("v_actual", "v_tile", "out_dtype", "single_buffer_w1"))
def cbow_forward(token_ids, emb_table, w1_p, w2_p, *, v_actual, v_tile,
                 out_dtype=jnp.bfloat16, single_buffer_w1=True):
    """token_ids: (B, C) int32; emb_table: (V, E) f32 (frozen);
    w1_p / w2_p: padded bf16 weights from prepare_params()."""
    B, _ = token_ids.shape
    E = emb_table.shape[1]
    E_pad, H_pad = w1_p.shape
    V_pad = w2_p.shape[1]
    num_vt = V_pad // v_tile

    # Embedding gather + CBOW context sum (wrapper side, fused under jit).
    # TODO(synk): fuse the gather into the kernel (scalar-prefetched token ids
    # + DMA row gather) once B*C*E is large enough to matter.
    x_sum = jnp.sum(jnp.take(emb_table, token_ids, axis=0), axis=1)   # (B, E)

    # Batch tile: multiple of 16 (bf16 sublane packing); 128 rows at large B
    # (MXU-friendly M); aim for >=2 batch grid steps so "parallel" can shard
    # across v7x's two TensorCores.
    if B >= 256:
        tb = 128
    elif B > 16:
        tb = _round_up((B + 1) // 2, 16)
    else:
        tb = _round_up(max(B, 1), 16)
    B_pad = _round_up(B, tb)
    num_bt = B_pad // tb

    x_p = jnp.zeros((B_pad, E_pad), jnp.bfloat16).at[:B, :E].set(
        x_sum.astype(jnp.bfloat16))

    out_bytes = jnp.dtype(out_dtype).itemsize
    cost = pl.CostEstimate(
        flops=int(2 * B_pad * E_pad * H_pad + 2 * (2 * B_pad * H_pad * V_pad)),
        transcendentals=int(2 * B_pad * V_pad),
        bytes_accessed=int(x_p.size * 2 + w1_p.size * 2
                           + 2 * num_bt * w2_p.size * 2
                           + B_pad * V_pad * out_bytes),
    )

    w1_spec_kwargs = {}
    if single_buffer_w1:
        # Constant block index -> one VMEM copy is enough (no wasted 2nd buffer).
        w1_spec_kwargs["pipeline_mode"] = pl.Buffered(1)

    kernel = functools.partial(cbow_kernel, v_actual=v_actual, v_pad=V_pad)
    out = pl.pallas_call(
        kernel,
        out_shape=jax.ShapeDtypeStruct((B_pad, V_pad), out_dtype),
        grid=(num_bt, 2, num_vt),
        in_specs=[
            # Batch-tiled activations; resident across the pass / vocab axes.
            pl.BlockSpec((tb, E_pad), lambda i, p, j: (i, 0)),
            # w1: weights resident across the whole grid.
            pl.BlockSpec((E_pad, H_pad), lambda i, p, j: (0, 0),
                         **w1_spec_kwargs),
            # w2: streamed one vocab tile at a time (double-buffered).
            pl.BlockSpec((H_pad, v_tile), lambda i, p, j: (0, j)),
        ],
        # Pass 0 is collapsed onto vocab block 0, so each output block is
        # DMA'd to HBM exactly once, right after its pass-1 write.
        out_specs=pl.BlockSpec((tb, v_tile), lambda i, p, j: (i, p * j)),
        scratch_shapes=[
            pltpu.VMEM((tb, H_pad), jnp.bfloat16),   # cached hidden activations
            pltpu.VMEM((tb, 1), jnp.float32),        # running max
            pltpu.VMEM((tb, 1), jnp.float32),        # running sum-exp
        ],
        compiler_params=pltpu.CompilerParams(
            dimension_semantics=("parallel", "arbitrary", "arbitrary"),
            vmem_limit_bytes=_vmem_limit_bytes(),
        ),
        cost_estimate=cost,
    )(x_p, w1_p, w2_p)

    if B_pad != B or V_pad != v_actual:      # skip the slice copy when unpadded
        out = out[:B, :v_actual]
    return out


if __name__ == "__main__":
    # Small shapes consistent with the module.
    B, C = 8, 4                 # batch, context window size
    VOCAB, EMB, HID = 256, 64, 128

    key = jax.random.PRNGKey(0)
    k_emb, k_w1, k_w2, k_ids = jax.random.split(key, 4)

    # Deterministic params (frozen embedding + two bias-free linears).
    emb_table = jax.random.normal(k_emb, (VOCAB, EMB), dtype=jnp.float32) * 0.1
    w1 = jax.random.normal(k_w1, (EMB, HID), dtype=jnp.float32) * (1.0 / EMB ** 0.5)
    w2 = jax.random.normal(k_w2, (HID, VOCAB), dtype=jnp.float32) * (1.0 / HID ** 0.5)
    token_ids = jax.random.randint(k_ids, (B, C), 0, VOCAB, dtype=jnp.int32)

    # One-time weight prep, hoisted out of the per-call forward path.
    w1_p, w2_p, v_tile = prepare_params(w1, w2)

    try:
        out = cbow_forward(token_ids, emb_table, w1_p, w2_p,
                           v_actual=VOCAB, v_tile=v_tile)
    except Exception:
        # Fallback for jax versions without single-buffered BlockSpec support.
        out = cbow_forward(token_ids, emb_table, w1_p, w2_p,
                           v_actual=VOCAB, v_tile=v_tile, single_buffer_w1=False)
    out = jax.block_until_ready(out)

    assert out.shape == (B, VOCAB)
    out_f32 = out.astype(jnp.float32)
    # Softmax rows sum to ~1 (bf16 output quantization slack).
    assert jnp.allclose(jnp.sum(out_f32, axis=-1), 1.0, atol=1e-2)

    # Functional check vs. plain-JAX f32 reference (bf16 matmul/output tol).
    x_ref = jnp.sum(jnp.take(emb_table, token_ids, axis=0), axis=1)
    ref = jax.nn.softmax(x_ref @ w1 @ w2, axis=-1)
    assert jnp.allclose(out_f32, ref, atol=2e-3)

    print("KERNEL_OK")
</pallas_src>

<mosaic_0001>
module attributes {stable_mosaic.version = 11 : i64} {
  func.func @cbow_kernel(%arg0: i32, %arg1: i32, %arg2: i32, %arg3: memref<16x128xbf16, #tpu.memory_space<vmem>>, %arg4: memref<128x128xbf16, #tpu.memory_space<vmem>>, %arg5: memref<128x256xbf16, #tpu.memory_space<vmem>>, %arg6: memref<16x256xbf16, #tpu.memory_space<vmem>>, %arg7: memref<16x128xbf16, #tpu.memory_space<vmem>>, %arg8: memref<16x1xf32, #tpu.memory_space<vmem>>, %arg9: memref<16x1xf32, #tpu.memory_space<vmem>>) attributes {dimension_semantics = [#tpu.dimension_semantics<parallel>, #tpu.dimension_semantics<arbitrary>, #tpu.dimension_semantics<arbitrary>], iteration_bounds = array<i64: 1, 2, 1>, scalar_prefetch = 0 : i64, scratch_operands = 3 : i64, tpu.core_type = #tpu.core_type<tc>, window_params = [{transform_indices = @transform_0, window_bounds = array<i64: 16, 128>}, {pipeline_mode = #tpu.pipeline_mode<synchronous>, transform_indices = @transform_1, window_bounds = array<i64: 128, 128>}, {transform_indices = @transform_2, window_bounds = array<i64: 128, 256>}, {transform_indices = @transform_3, window_bounds = array<i64: 16, 256>}]} {
    %c0_i32 = arith.constant 0 : i32
    %0 = arith.cmpi eq, %arg1, %c0_i32 : i32
    %c0_i32_0 = arith.constant 0 : i32
    %1 = arith.cmpi eq, %arg2, %c0_i32_0 : i32
    %2 = arith.andi %0, %1 : i1
    %3 = arith.extui %2 : i1 to i32
    %c0_i32_1 = arith.constant 0 : i32
    %4 = arith.cmpi ne, %3, %c0_i32_1 : i32
    scf.if %4 {
      %c0_8 = arith.constant 0 : index
      %c0_9 = arith.constant 0 : index
      %14 = vector.load %arg3[%c0_8, %c0_9] : memref<16x128xbf16, #tpu.memory_space<vmem>>, vector<16x128xbf16>
      %c0_10 = arith.constant 0 : index
      %c0_11 = arith.constant 0 : index
      %15 = vector.load %arg4[%c0_10, %c0_11] : memref<128x128xbf16, #tpu.memory_space<vmem>>, vector<128x128xbf16>
      %cst_12 = arith.constant dense<0.000000e+00> : vector<16x128xf32>
      %16 = tpu.matmul %14, %15, %cst_12 {dimension_numbers = #tpu.dot_dimension_numbers<[1], [0], [0], [1], [0, 0, 1, 1], [], []>} : vector<16x128xbf16>, vector<128x128xbf16>, vector<16x128xf32> -> vector<16x128xf32>
      %17 = arith.truncf %16 : vector<16x128xf32> to vector<16x128xbf16>
      %c0_13 = arith.constant 0 : index
      %c0_14 = arith.constant 0 : index
      %18 = vector.load %arg7[%c0_13, %c0_14] : memref<16x128xbf16, #tpu.memory_space<vmem>>, vector<16x128xbf16>
      tpu.vector_store %arg7[%c0_13, %c0_14], %17 {strides = array<i32>} : memref<16x128xbf16, #tpu.memory_space<vmem>>, vector<16x128xbf16>,
      %cst_15 = arith.constant 0xFF800000 : f32
      %19 = vector.broadcast %cst_15 : f32 to vector<16x1xf32>
      %c0_16 = arith.constant 0 : index
      %c0_17 = arith.constant 0 : index
      %20 = vector.load %arg8[%c0_16, %c0_17] : memref<16x1xf32, #tpu.memory_space<vmem>>, vector<16x1xf32>
      tpu.vector_store %arg8[%c0_16, %c0_17], %19 {strides = array<i32>} : memref<16x1xf32, #tpu.memory_space<vmem>>, vector<16x1xf32>,
      %cst_18 = arith.constant 0.000000e+00 : f32
      %21 = vector.broadcast %cst_18 : f32 to vector<16x1xf32>
      %c0_19 = arith.constant 0 : index
      %c0_20 = arith.constant 0 : index
      %22 = vector.load %arg9[%c0_19, %c0_20] : memref<16x1xf32, #tpu.memory_space<vmem>>, vector<16x1xf32>
      tpu.vector_store %arg9[%c0_19, %c0_20], %21 {strides = array<i32>} : memref<16x1xf32, #tpu.memory_space<vmem>>, vector<16x1xf32>,
    } else {
    }
    %c0 = arith.constant 0 : index
    %c0_2 = arith.constant 0 : index
    %5 = vector.load %arg7[%c0, %c0_2] : memref<16x128xbf16, #tpu.memory_space<vmem>>, vector<16x128xbf16>
    %c0_3 = arith.constant 0 : index
    %c0_4 = arith.constant 0 : index
    %6 = vector.load %arg5[%c0_3, %c0_4] : memref<128x256xbf16, #tpu.memory_space<vmem>>, vector<128x256xbf16>
    %cst = arith.constant dense<0.000000e+00> : vector<16x256xf32>
    %7 = tpu.matmul %5, %6, %cst {dimension_numbers = #tpu.dot_dimension_numbers<[1], [0], [0], [1], [0, 0, 1, 1], [], []>} : vector<16x128xbf16>, vector<128x256xbf16>, vector<16x256xf32> -> vector<16x256xf32>
    %c0_i32_5 = arith.constant 0 : i32
    %8 = arith.cmpi eq, %arg1, %c0_i32_5 : i32
    %9 = arith.extui %8 : i1 to i32
    %c0_i32_6 = arith.constant 0 : i32
    %10 = arith.cmpi ne, %9, %c0_i32_6 : i32
    scf.if %10 {
      %c0_8 = arith.constant 0 : index
      %c0_9 = arith.constant 0 : index
      %14 = vector.load %arg8[%c0_8, %c0_9] : memref<16x1xf32, #tpu.memory_space<vmem>>, vector<16x1xf32>
      %cst_10 = arith.constant dense<0xFF800000> : vector<16xf32>
      %15 = vector.multi_reduction <maximumf>, %7, %cst_10 [1] : vector<16x256xf32> to vector<16xf32>
      %16 = vector.shape_cast %15 : vector<16xf32> to vector<16x1xf32>
      %17 = arith.maximumf %14, %16 : vector<16x1xf32>
      %c0_11 = arith.constant 0 : index
      %c0_12 = arith.constant 0 : index
      %18 = vector.load %arg9[%c0_11, %c0_12] : memref<16x1xf32, #tpu.memory_space<vmem>>, vector<16x1xf32>
      %19 = arith.subf %14, %17 : vector<16x1xf32>
      %20 = math.exp %19 : vector<16x1xf32>
      %21 = arith.mulf %18, %20 : vector<16x1xf32>
      %22 = vector.broadcast %17 : vector<16x1xf32> to vector<16x256xf32>
      %23 = arith.subf %7, %22 : vector<16x256xf32>
      %24 = math.exp %23 : vector<16x256xf32>
      %cst_13 = arith.constant dense<0.000000e+00> : vector<16xf32>
      %25 = vector.multi_reduction <add>, %24, %cst_13 [1] : vector<16x256xf32> to vector<16xf32>
      %26 = vector.shape_cast %25 : vector<16xf32> to vector<16x1xf32>
      %27 = arith.addf %21, %26 : vector<16x1xf32>
      %c0_14 = arith.constant 0 : index
      %c0_15 = arith.constant 0 : index
      %28 = vector.load %arg9[%c0_14, %c0_15] : memref<16x1xf32, #tpu.memory_space<vmem>>, vector<16x1xf32>
      tpu.vector_store %arg9[%c0_14, %c0_15], %27 {strides = array<i32>} : memref<16x1xf32, #tpu.memory_space<vmem>>, vector<16x1xf32>,
      %c0_16 = arith.constant 0 : index
      %c0_17 = arith.constant 0 : index
      %29 = vector.load %arg8[%c0_16, %c0_17] : memref<16x1xf32, #tpu.memory_space<vmem>>, vector<16x1xf32>
      tpu.vector_store %arg8[%c0_16, %c0_17], %17 {strides = array<i32>} : memref<16x1xf32, #tpu.memory_space<vmem>>, vector<16x1xf32>,
    } else {
    }
    %c1_i32 = arith.constant 1 : i32
    %11 = arith.cmpi eq, %arg1, %c1_i32 : i32
    %12 = arith.extui %11 : i1 to i32
    %c0_i32_7 = arith.constant 0 : i32
    %13 = arith.cmpi ne, %12, %c0_i32_7 : i32
    scf.if %13 {
      %c0_8 = arith.constant 0 : index
      %c0_9 = arith.constant 0 : index
      %14 = vector.load %arg9[%c0_8, %c0_9] : memref<16x1xf32, #tpu.memory_space<vmem>>, vector<16x1xf32>
      %cst_10 = arith.constant 1.000000e+00 : f32
      %15 = vector.broadcast %cst_10 : f32 to vector<16x1xf32>
      %16 = arith.divf %15, %14 : vector<16x1xf32>
      %c0_11 = arith.constant 0 : index
      %c0_12 = arith.constant 0 : index
      %17 = vector.load %arg8[%c0_11, %c0_12] : memref<16x1xf32, #tpu.memory_space<vmem>>, vector<16x1xf32>
      %18 = vector.broadcast %17 : vector<16x1xf32> to vector<16x256xf32>
      %19 = arith.subf %7, %18 : vector<16x256xf32>
      %20 = math.exp %19 : vector<16x256xf32>
      %21 = vector.broadcast %16 : vector<16x1xf32> to vector<16x256xf32>
      %22 = arith.mulf %20, %21 : vector<16x256xf32>
      %23 = arith.truncf %22 : vector<16x256xf32> to vector<16x256xbf16>
      %c0_13 = arith.constant 0 : index
      %c0_14 = arith.constant 0 : index
      %24 = vector.load %arg6[%c0_13, %c0_14] : memref<16x256xbf16, #tpu.memory_space<vmem>>, vector<16x256xbf16>
      tpu.vector_store %arg6[%c0_13, %c0_14], %23 {strides = array<i32>} : memref<16x256xbf16, #tpu.memory_space<vmem>>, vector<16x256xbf16>,
    } else {
    }
    return
  }
  func.func @transform_0(%arg0: i32, %arg1: i32, %arg2: i32) -> (i32, i32) {
    %c0_i32 = arith.constant 0 : i32
    %c0_i32_0 = arith.constant 0 : i32
    return %arg0, %c0_i32 : i32, i32
  }
  func.func @transform_1(%arg0: i32, %arg1: i32, %arg2: i32) -> (i32, i32) {
    %c0_i32 = arith.constant 0 : i32
    %c0_i32_0 = arith.constant 0 : i32
    %c0_i32_1 = arith.constant 0 : i32
    return %c0_i32, %c0_i32_0 : i32, i32
  }
  func.func @transform_2(%arg0: i32, %arg1: i32, %arg2: i32) -> (i32, i32) {
    %c0_i32 = arith.constant 0 : i32
    %c0_i32_0 = arith.constant 0 : i32
    return %c0_i32, %arg2 : i32, i32
  }
  func.func @transform_3(%arg0: i32, %arg1: i32, %arg2: i32) -> (i32, i32) {
    %0 = arith.muli %arg1, %arg2 : i32
    %c0_i32 = arith.constant 0 : i32
    return %arg0, %0 : i32, i32
  }
}

module attributes {stable_mosaic.version = 11 : i64} {
  func.func @cbow_kernel(%arg0: i32, %arg1: i32, %arg2: i32, %arg3: memref<16x128xbf16, #tpu.memory_space<vmem>>, %arg4: memref<128x128xbf16, #tpu.memory_space<vmem>>, %arg5: memref<128x256xbf16, #tpu.memory_space<vmem>>, %arg6: memref<16x256xbf16, #tpu.memory_space<vmem>>, %arg7: memref<16x128xbf16, #tpu.memory_space<vmem>>, %arg8: memref<16x1xf32, #tpu.memory_space<vmem>>, %arg9: memref<16x1xf32, #tpu.memory_space<vmem>>) attributes {dimension_semantics = [#tpu.dimension_semantics<parallel>, #tpu.dimension_semantics<arbitrary>, #tpu.dimension_semantics<arbitrary>], iteration_bounds = array<i64: 1, 2, 1>, scalar_prefetch = 0 : i64, scratch_operands = 3 : i64, tpu.core_type = #tpu.core_type<tc>, window_params = [{transform_indices = @transform_0, window_bounds = array<i64: 16, 128>}, {pipeline_mode = #tpu.pipeline_mode<synchronous>, transform_indices = @transform_1, window_bounds = array<i64: 128, 128>}, {transform_indices = @transform_2, window_bounds = array<i64: 128, 256>}, {transform_indices = @transform_3, window_bounds = array<i64: 16, 256>}]} {
    %c0_i32 = arith.constant 0 : i32
    %0 = arith.cmpi eq, %arg1, %c0_i32 : i32
    %c0_i32_0 = arith.constant 0 : i32
    %1 = arith.cmpi eq, %arg2, %c0_i32_0 : i32
    %2 = arith.andi %0, %1 : i1
    %3 = arith.extui %2 : i1 to i32
    %c0_i32_1 = arith.constant 0 : i32
    %4 = arith.cmpi ne, %3, %c0_i32_1 : i32
    scf.if %4 {
      %c0_8 = arith.constant 0 : index
      %c0_9 = arith.constant 0 : index
      %14 = vector.load %arg3[%c0_8, %c0_9] : memref<16x128xbf16, #tpu.memory_space<vmem>>, vector<16x128xbf16>
      %c0_10 = arith.constant 0 : index
      %c0_11 = arith.constant 0 : index
      %15 = vector.load %arg4[%c0_10, %c0_11] : memref<128x128xbf16, #tpu.memory_space<vmem>>, vector<128x128xbf16>
      %cst_12 = arith.constant dense<0.000000e+00> : vector<16x128xf32>
      %16 = tpu.matmul %14, %15, %cst_12 {dimension_numbers = #tpu.dot_dimension_numbers<[1], [0], [0], [1], [0, 0, 1, 1], [], []>} : vector<16x128xbf16>, vector<128x128xbf16>, vector<16x128xf32> -> vector<16x128xf32>
      %17 = arith.truncf %16 : vector<16x128xf32> to vector<16x128xbf16>
      %c0_13 = arith.constant 0 : index
      %c0_14 = arith.constant 0 : index
      %18 = vector.load %arg7[%c0_13, %c0_14] : memref<16x128xbf16, #tpu.memory_space<vmem>>, vector<16x128xbf16>
      tpu.vector_store %arg7[%c0_13, %c0_14], %17 {strides = array<i32>} : memref<16x128xbf16, #tpu.memory_space<vmem>>, vector<16x128xbf16>,
      %cst_15 = arith.constant 0xFF800000 : f32
      %19 = vector.broadcast %cst_15 : f32 to vector<16x1xf32>
      %c0_16 = arith.constant 0 : index
      %c0_17 = arith.constant 0 : index
      %20 = vector.load %arg8[%c0_16, %c0_17] : memref<16x1xf32, #tpu.memory_space<vmem>>, vector<16x1xf32>
      tpu.vector_store %arg8[%c0_16, %c0_17], %19 {strides = array<i32>} : memref<16x1xf32, #tpu.memory_space<vmem>>, vector<16x1xf32>,
      %cst_18 = arith.constant 0.000000e+00 : f32
      %21 = vector.broadcast %cst_18 : f32 to vector<16x1xf32>
      %c0_19 = arith.constant 0 : index
      %c0_20 = arith.constant 0 : index
      %22 = vector.load %arg9[%c0_19, %c0_20] : memref<16x1xf32, #tpu.memory_space<vmem>>, vector<16x1xf32>
      tpu.vector_store %arg9[%c0_19, %c0_20], %21 {strides = array<i32>} : memref<16x1xf32, #tpu.memory_space<vmem>>, vector<16x1xf32>,
    } else {
    }
    %c0 = arith.constant 0 : index
    %c0_2 = arith.constant 0 : index
    %5 = vector.load %arg7[%c0, %c0_2] : memref<16x128xbf16, #tpu.memory_space<vmem>>, vector<16x128xbf16>
    %c0_3 = arith.constant 0 : index
    %c0_4 = arith.constant 0 : index
    %6 = vector.load %arg5[%c0_3, %c0_4] : memref<128x256xbf16, #tpu.memory_space<vmem>>, vector<128x256xbf16>
    %cst = arith.constant dense<0.000000e+00> : vector<16x256xf32>
    %7 = tpu.matmul %5, %6, %cst {dimension_numbers = #tpu.dot_dimension_numbers<[1], [0], [0], [1], [0, 0, 1, 1], [], []>} : vector<16x128xbf16>, vector<128x256xbf16>, vector<16x256xf32> -> vector<16x256xf32>
    %c0_i32_5 = arith.constant 0 : i32
    %8 = arith.cmpi eq, %arg1, %c0_i32_5 : i32
    %9 = arith.extui %8 : i1 to i32
    %c0_i32_6 = arith.constant 0 : i32
    %10 = arith.cmpi ne, %9, %c0_i32_6 : i32
    scf.if %10 {
      %c0_8 = arith.constant 0 : index
      %c0_9 = arith.constant 0 : index
      %14 = vector.load %arg8[%c0_8, %c0_9] : memref<16x1xf32, #tpu.memory_space<vmem>>, vector<16x1xf32>
      %cst_10 = arith.constant dense<0xFF800000> : vector<16xf32>
      %15 = vector.multi_reduction <maximumf>, %7, %cst_10 [1] : vector<16x256xf32> to vector<16xf32>
      %16 = vector.shape_cast %15 : vector<16xf32> to vector<16x1xf32>
      %17 = arith.maximumf %14, %16 : vector<16x1xf32>
      %c0_11 = arith.constant 0 : index
      %c0_12 = arith.constant 0 : index
      %18 = vector.load %arg9[%c0_11, %c0_12] : memref<16x1xf32, #tpu.memory_space<vmem>>, vector<16x1xf32>
      %19 = arith.subf %14, %17 : vector<16x1xf32>
      %20 = math.exp %19 : vector<16x1xf32>
      %21 = arith.mulf %18, %20 : vector<16x1xf32>
      %22 = vector.broadcast %17 : vector<16x1xf32> to vector<16x256xf32>
      %23 = arith.subf %7, %22 : vector<16x256xf32>
      %24 = math.exp %23 : vector<16x256xf32>
      %cst_13 = arith.constant dense<0.000000e+00> : vector<16xf32>
      %25 = vector.multi_reduction <add>, %24, %cst_13 [1] : vector<16x256xf32> to vector<16xf32>
      %26 = vector.shape_cast %25 : vector<16xf32> to vector<16x1xf32>
      %27 = arith.addf %21, %26 : vector<16x1xf32>
      %c0_14 = arith.constant 0 : index
      %c0_15 = arith.constant 0 : index
      %28 = vector.load %arg9[%c0_14, %c0_15] : memref<16x1xf32, #tpu.memory_space<vmem>>, vector<16x1xf32>
      tpu.vector_store %arg9[%c0_14, %c0_15], %27 {strides = array<i32>} : memref<16x1xf32, #tpu.memory_space<vmem>>, vector<16x1xf32>,
      %c0_16 = arith.constant 0 : index
      %c0_17 = arith.constant 0 : index
      %29 = vector.load %arg8[%c0_16, %c0_17] : memref<16x1xf32, #tpu.memory_space<vmem>>, vector<16x1xf32>
      tpu.vector_store %arg8[%c0_16, %c0_17], %17 {strides = array<i32>} : memref<16x1xf32, #tpu.memory_space<vmem>>, vector<16x1xf32>,
    } else {
    }
    %c1_i32 = arith.constant 1 : i32
    %11 = arith.cmpi eq, %arg1, %c1_i32 : i32
    %12 = arith.extui %11 : i1 to i32
    %c0_i32_7 = arith.constant 0 : i32
    %13 = arith.cmpi ne, %12, %c0_i32_7 : i32
    scf.if %13 {
      %c0_8 = arith.constant 0 : index
      %c0_9 = arith.constant 0 : index
      %14 = vector.load %arg9[%c0_8, %c0_9] : memref<16x1xf32, #tpu.memory_space<vmem>>, vector<16x1xf32>
      %cst_10 = arith.constant 1.000000e+00 : f32
      %15 = vector.broadcast %cst_10 : f32 to vector<16x1xf32>
      %16 = arith.divf %15, %14 : vector<16x1xf32>
      %c0_11 = arith.constant 0 : index
      %c0_12 = arith.constant 0 : index
      %17 = vector.load %arg8[%c0_11, %c0_12] : memref<16x1xf32, #tpu.memory_space<vmem>>, vector<16x1xf32>
      %18 = vector.broadcast %17 : vector<16x1xf32> to vector<16x256xf32>
      %19 = arith.subf %7, %18 : vector<16x256xf32>
      %20 = math.exp %19 : vector<16x256xf32>
      %21 = vector.broadcast %16 : vector<16x1xf32> to vector<16x256xf32>
      %22 = arith.mulf %20, %21 : vector<16x256xf32>
      %23 = arith.truncf %22 : vector<16x256xf32> to vector<16x256xbf16>
      %c0_13 = arith.constant 0 : index
      %c0_14 = arith.constant 0 : index
      %24 = vector.load %arg6[%c0_13, %c0_14] : memref<16x256xbf16, #tpu.memory_space<vmem>>, vector<16x256xbf16>
      tpu.vector_store %arg6[%c0_13, %c0_14], %23 {strides = array<i32>} : memref<16x256xbf16, #tpu.memory_space<vmem>>, vector<16x256xbf16>,
    } else {
    }
    return
  }
  func.func @transform_0(%arg0: i32, %arg1: i32, %arg2: i32) -> (i32, i32) {
    %c0_i32 = arith.constant 0 : i32
    %c0_i32_0 = arith.constant 0 : i32
    return %arg0, %c0_i32 : i32, i32
  }
  func.func @transform_1(%arg0: i32, %arg1: i32, %arg2: i32) -> (i32, i32) {
    %c0_i32 = arith.constant 0 : i32
    %c0_i32_0 = arith.constant 0 : i32
    %c0_i32_1 = arith.constant 0 : i32
    return %c0_i32, %c0_i32_0 : i32, i32
  }
  func.func @transform_2(%arg0: i32, %arg1: i32, %arg2: i32) -> (i32, i32) {
    %c0_i32 = arith.constant 0 : i32
    %c0_i32_0 = arith.constant 0 : i32
    return %c0_i32, %arg2 : i32, i32
  }
  func.func @transform_3(%arg0: i32, %arg1: i32, %arg2: i32) -> (i32, i32) {
    %0 = arith.muli %arg1, %arg2 : i32
    %c0_i32 = arith.constant 0 : i32
    return %arg0, %0 : i32, i32
  }
}

</mosaic_0001>

<bundles_post_ra>
// kernel: cbow_forward.1
= control target key start
LH: loop header
LB: loop body
LE: loop exit
PB: predicated region body
PF: predicated region fallthrough
CT: control target
= control target key end

     0   :  { %s941_s12 = smov 0   ;;  %s943_s13 = smov 0   ;;  %s1078_s0 = inlined_call_operand.vmem [shape: bf16[16,128], index: 0, kind: input, shape index: {}]   ;;  %s1079_s1 = inlined_call_operand.vmem [shape: bf16[128,128], index: 1, kind: input, shape index: {}]   ;;  %s1080_s2 = inlined_call_operand.vmem [shape: bf16[128,256], index: 2, kind: input, shape index: {}]   ;;  %s1081_s3 = inlined_call_operand.vmem [shape: bf16[16,256], index: 3, kind: output, shape index: {}]  }
   0x1   :  { %s945_s14 = smov 0  }
   0x2 LB: > { %s28_s15 = sadd.s32 1, %s909_s13  ;;  %p733_p0 = scmp.ge.s32.totalorder %s913_s14, 1  ;;  %s913_s14 = sphi %s945_s14, %s13_s14   ;;  %s909_s13 = sphi %s943_s13, %s1083_s13   ;;  %s905_s12 = sphi %s941_s12, %s1082_s12  }
   0x3   : > { %p30_p1 = scmp.ge.s32.totalorder %s28_s15, 2  ;;  %p172_p2 = scmp.lt.s32.totalorder %s913_s14, 3 }
   0x5   : > { %s1085_s15 = smov (%p30_p1, %s28_s15), 0  ;;  %p173_p3 = pnand %p733_p0, %p172_p2 }
   0x6   : > { %p234_p4 = scmp.eq.s32.totalorder (!%p173_p3), %s905_s12, 0 }
   0x7   : > { %176 = sbr.rel (%p173_p3) target bundleno = 1107 (0x453), region = 32 }
   0xe   : > { %239 = sbr.rel (!%p234_p4) target bundleno = 264 (0x108), region = 36  ;;  %vm355_vm0 = vcmask (%p234_p4), 7168   ;;  %v830_v0 = vld [vmem:[%s1079_s1] sm:$0xff] (%p234_p4)   ;;  %v915_v1 = vmov (%p234_p4), 0.0   ;;  %v916_v2 = vmov (%p234_p4), -inf   ;;  %v831_v3 = vld [vmem:[%s1079_s1 + $0x8] sm:$0xff] (%p234_p4)  }
   0xf   : > { %780 = vmatprep.subr.bf16.mxu0 (%p234_p4), %v915_v1  ;;  %356 = vst.msk [vmem:[#allocation3] sm:$0xff] (%p234_p4), %vm355_vm0, %v916_v2  ;;  %357 = vst.msk [vmem:[#allocation3 + $0x8] sm:$0xff] (%p234_p4), %vm355_vm0, %v916_v2  ;;  %vm917_vm1 = vmmov (%p234_p4), 0   ;;  %v832_v4 = vld [vmem:[%s1079_s1 + $0x10] sm:$0xff] (%p234_p4)   ;;  %v833_v5 = vld [vmem:[%s1079_s1 + $0x18] sm:$0xff] (%p234_p4)  }
  0x10   : > { %358 = vst.msk [vmem:[#allocation4] sm:$0xff] (%p234_p4), %vm355_vm0, %v915_v1  ;;  %359 = vst.msk [vmem:[#allocation4 + $0x8] sm:$0xff] (%p234_p4), %vm355_vm0, %v915_v1  ;;  %781 = vmatpush3.bf16.msra.mxu0 (%p234_p4), %v830_v0  ;;  %796 = vmatprep.mubr.msk.bf16.mxu0 (%p234_p4), %vm917_vm1, %v915_v1  ;;  %v834_v6 = vld [vmem:[%s1079_s1 + $0x20] sm:$0xff] (%p234_p4)   ;;  %v835_v7 = vld [vmem:[%s1079_s1 + $0x28] sm:$0xff] (%p234_p4)  }
  0x11   : > { %782 = vmatprep.subr.bf16.mxu0 (%p234_p4), %v915_v1  ;;  %v836_v8 = vld [vmem:[%s1079_s1 + $0x30] sm:$0xff] (%p234_p4)   ;;  %v837_v9 = vld [vmem:[%s1079_s1 + $0x38] sm:$0xff] (%p234_p4)   ;;  %v838_v10 = vld [vmem:[%s1078_s0] sm:$0xff] (%p234_p4)  }
  0x14   : > { %783 = vmatpush3.bf16.msra.mxu0 (%p234_p4), %v831_v3 }
  0x15   : > { %784 = vmatprep.subr.bf16.mxu0 %v915_v1 }
  0x18   : > { %785 = vmatpush3.bf16.msra.mxu0 %v832_v4 }
  0x19   : > { %786 = vmatprep.subr.bf16.mxu0 %v915_v1 }
  0x1c   : > { %787 = vmatpush3.bf16.msra.mxu0 %v833_v5 }
  0x1d   : > { %788 = vmatprep.subr.bf16.mxu0 %v915_v1 }
  0x20   : > { %789 = vmatpush3.bf16.msra.mxu0 %v834_v6 }
  0x21   : > { %790 = vmatprep.subr.bf16.mxu0 %v915_v1 }
  0x24   : > { %791 = vmatpush3.bf16.msra.mxu0 %v835_v7 }
  0x25   : > { %792 = vmatprep.subr.bf16.mxu0 %v915_v1 }
  0x28   : > { %793 = vmatpush3.bf16.msra.mxu0 %v836_v8 }
  0x29   : > { %794 = vmatprep.subr.bf16.mxu0 %v915_v1 }
  0x2c   : > { %795 = vmatpush3.bf16.msra.mxu0 %v837_v9 }
  0x2f   : > { %797 = vmatmul.mubr.bf16.vlgmr.msra.gmra.mrb[0].mxu0 %v838_v10 }
 0x102   : > { %v346_v11 = vpop.f32.mrb[0].mxu0 }
 0x103   : > { %v798_v12 = vpop.f32.mrb[1].mxu0 }
 0x104   : > { %v349_v13 = vpop.f32.mrb[2].mxu0 }
 0x105   : > { %v353_v14 = vpack.c.bf16 %v349_v13, %v346_v11  ;;  %v799_v15 = vpop.f32.mrb[3].mxu0 }
 0x107   : > { %354 = vst [vmem:[#allocation2] sm:$0xff] %v353_v14 }
 0x108 PF: > { %v839_v16 = vld [vmem:[%s1080_s2 + $0x4] ss:$8 sps:$4 sm:$0xff]   ;;  %v841_v17 = vld [vmem:[%s1080_s2] ss:$8 sps:$4 sm:$0xff]   ;;  %v918_v18 = vmov 0   ;;  %p760_p5 = scmp.ne.s32.totalorder %s905_s12, 0 }
 0x109   : > { %489 = vmatprep.mubr.bf16.mxu0 %v918_v18  ;;  %457 = vmatprep.subr.bf16.mxu0 %v839_v16  ;;  %v842_v19 = vld [vmem:[%s1080_s2 + $0x14] ss:$8 sps:$4 sm:$0xff]   ;;  %v844_v20 = vld [vmem:[%s1080_s2 + $0x10] ss:$8 sps:$4 sm:$0xff]   ;;  %v845_v21 = vld [vmem:[%s1080_s2 + $0x24] ss:$8 sps:$4 sm:$0xff]  }
 0x10a   : > { %458 = vmatpush1.bf16.msra.mxu0 %v841_v17  ;;  %v847_v22 = vld [vmem:[%s1080_s2 + $0x20] ss:$8 sps:$4 sm:$0xff]   ;;  %v848_v23 = vld [vmem:[%s1080_s2 + $0x34] ss:$8 sps:$4 sm:$0xff]   ;;  %v850_v24 = vld [vmem:[%s1080_s2 + $0x30] ss:$8 sps:$4 sm:$0xff]  }
 0x10b   : > { %459 = vmatprep.subr.bf16.mxu0 %v842_v19  ;;  %v851_v25 = vld [vmem:[%s1080_s2 + $0x44] ss:$8 sps:$4 sm:$0xff]   ;;  %v853_v26 = vld [vmem:[%s1080_s2 + $0x40] ss:$8 sps:$4 sm:$0xff]   ;;  %v854_v27 = vld [vmem:[%s1080_s2 + $0x54] ss:$8 sps:$4 sm:$0xff]  }
 0x10c   : > { %v856_v28 = vld [vmem:[%s1080_s2 + $0x50] ss:$8 sps:$4 sm:$0xff]   ;;  %v857_v29 = vld [vmem:[%s1080_s2 + $0x64] ss:$8 sps:$4 sm:$0xff]   ;;  %v859_v30 = vld [vmem:[%s1080_s2 + $0x60] ss:$8 sps:$4 sm:$0xff]  }
 0x10d   : > { %v860_v31 = vld [vmem:[%s1080_s2 + $0x74] ss:$8 sps:$4 sm:$0xff]   ;;  %v862_v32 = vld [vmem:[%s1080_s2 + $0x70] ss:$8 sps:$4 sm:$0xff]   ;;  %v919_v40 = vmov (!%p760_p5), 0   ;;  %v503_v41 = vld [vmem:[#allocation3] sm:$0xff] (!%p760_p5) }
 0x10e   : > { %460 = vmatpush1.bf16.msra.mxu0 %v844_v20  ;;  %v360_v33 = vld [vmem:[#allocation2] sm:$0xff]  ;;  %863 = vset.pattern.permute.xlu1 (!%p760_p5), %v919_v40  ;;  %vm553_vm2 = vcmask (!%p760_p5), 7168   ;;  %v504_v44 = vld [vmem:[#allocation3 + $0x8] sm:$0xff] (!%p760_p5)  ;;  %v513_v4 = vld [vmem:[#allocation4] sm:$0xff] (!%p760_p5) }
 0x10f   : > { %461 = vmatprep.subr.bf16.mxu0 %v845_v21  ;;  %864 = vset.pattern.permute.xlu0 (!%p760_p5), %v919_v40  ;;  %v514_v8 = vld [vmem:[#allocation4 + $0x8] sm:$0xff] (!%p760_p5) }
 0x112   : > { %462 = vmatpush1.bf16.msra.mxu0 %v847_v22 }
 0x113   : > { %463 = vmatprep.subr.bf16.mxu0 %v848_v23 }
 0x116   : > { %464 = vmatpush1.bf16.msra.mxu0 %v850_v24 }
 0x117   : > { %465 = vmatprep.subr.bf16.mxu0 %v851_v25 }
 0x11a   : > { %466 = vmatpush1.bf16.msra.mxu0 %v853_v26 }
 0x11b   : > { %467 = vmatprep.subr.bf16.mxu0 %v854_v27 }
 0x11e   : > { %468 = vmatpush1.bf16.msra.mxu0 %v856_v28 }
 0x11f   : > { %469 = vmatprep.subr.bf16.mxu0 %v857_v29 }
 0x122   : > { %470 = vmatpush1.bf16.msra.mxu0 %v859_v30 }
 0x123   : > { %471 = vmatprep.subr.bf16.mxu0 %v860_v31 }
 0x126   : > { %472 = vmatpush1.bf16.msra.mxu0 %v862_v32 }
 0x129   : > { %490 = vmatmul.mubr.bf16.vlgmr.msra.gmra.mrb[0].mxu0 %v360_v33 }
 0x1f9   : > { %502 = sbr.rel (%p760_p5) target bundleno = 951 (0x3b7), region = 40 }
 0x1fc   : > { %v1037_v34 = vpop.f32.mrb[0].mxu0 }
 0x1fd   : > { %v1039_v35 = vpop.f32.mrb[1].mxu0 }
 0x1fe   : > { %v1041_v36 = vpop.f32.mrb[2].mxu0  ;;  %v505_v38 = vmax.f32 (!%p760_p5), %v1037_v34, %v1039_v35 }
 0x1ff   : > { %v1043_v37 = vpop.f32.mrb[3].mxu0 }
 0x200   : > { %506 = vmax.xlane.f32.xlu0 %v505_v38  ;;  %v508_v39 = vmax.f32 %v1041_v36, %v1043_v37 }
 0x204   : > { %509 = vmax.xlane.f32.xlu0 %v508_v39 }
 0x28d   : > { %v507_v42 = vpop.xlane.xlu0 %506 }
 0x28e   : > { %v511_v43 = vmax.f32 %v503_v41, %v507_v42 }
 0x290   : > { %v515_v45 = vsub.f32 %v503_v41, %v511_v43  ;;  %556 = vst.msk [vmem:[#allocation3] sm:$0xff] %vm553_vm2, %v511_v43  ;;  %525 = vperm.xlu1 %863, %v511_v43  }
 0x291   : > { %v510_v46 = vpop.xlane.xlu0 %509 }
 0x292   : > { %v512_v47 = vmax.f32 %v504_v44, %v510_v46  ;;  %v517_v1 = vmul.f32 1.442695, %v515_v45 }
 0x294   : > { %v516_v48 = vsub.f32 %v504_v44, %v512_v47  ;;  %557 = vst.msk [vmem:[#allocation3 + $0x8] sm:$0xff] %vm553_vm2, %v512_v47  ;;  %530 = vperm.xlu1 %863, %v512_v47  }
 0x296   : > { %v519_v2 = vmul.f32 1.442695, %v516_v48 }
 0x30f   : > { %v526_v49 = vpop.permute.xlu1 %525 }
 0x310   : > { %v533_v50 = vsub.f32 %v1037_v34, %v526_v49  ;;  %v534_v51 = vsub.f32 %v1039_v35, %v526_v49 }
 0x312   : > { %v537_v52 = vmul.f32 1.442695, %v533_v50  ;;  %v539_v53 = vmul.f32 1.442695, %v534_v51 }
 0x313   : > { %v531_v54 = vpop.permute.xlu1 %530 }
 0x314   : > { %865 = vpow2.f32 %v537_v52  ;;  %v535_v55 = vsub.f32 %v1041_v36, %v531_v54  ;;  %v536_v56 = vsub.f32 %v1043_v37, %v531_v54 }
 0x315   : > { %867 = vpow2.f32 %v539_v53 }
 0x316   : > { %v541_v57 = vmul.f32 1.442695, %v535_v55  ;;  %v543_v58 = vmul.f32 1.442695, %v536_v56 }
 0x318   : > { %869 = vpow2.f32 %v541_v57 }
 0x319   : > { %871 = vpow2.f32 %v543_v58 }
 0x31a   : > { %873 = vpow2.f32 %v517_v1 }
 0x31b   : > { %875 = vpow2.f32 %v519_v2 }
 0x31e   : > { %v866_v59 = vpop.eup %865 }
 0x31f   : > { %v868_v60 = vpop.eup %867 }
 0x320   : > { %v545_v61 = vadd.f32 %v868_v60, %v866_v59 }
 0x322   : > { %v870_v62 = vpop.eup %869  ;;  %546 = vadd.xlane.f32.xlu0 %v545_v61 }
 0x323   : > { %v872_v63 = vpop.eup %871 }
 0x324   : > { %v548_v0 = vadd.f32 %v872_v63, %v870_v62  ;;  %v874_v3 = vpop.eup %873 }
 0x325   : > { %v521_v5 = vmul.f32 %v874_v3, %v513_v4  ;;  %v876_v6 = vpop.eup %875 }
 0x326   : > { %549 = vadd.xlane.f32.xlu1 %v548_v0  ;;  %v522_v10 = vmul.f32 %v876_v6, %v514_v8 }
 0x3af   : > { %v547_v7 = vpop.xlane.xlu0 %546 }
 0x3b0   : > { %v551_v9 = vadd.f32 %v547_v7, %v521_v5 }
 0x3b2   : > { %554 = vst.msk [vmem:[#allocation4] sm:$0xff] %vm553_vm2, %v551_v9 }
 0x3b3   : > { %v550_v11 = vpop.xlane.xlu1 %549 }
 0x3b4   : > { %v552_v12 = vadd.f32 %v550_v11, %v522_v10 }
 0x3b6   : > { %555 = vst.msk [vmem:[#allocation4 + $0x8] sm:$0xff] %vm553_vm2, %v552_v12 }
 0x3b7 PF: > { %p761_p6 = scmp.ne.s32.totalorder %s905_s12, 1 }
 0x3b8   : > { %v568_v13 = vld [vmem:[#allocation3] sm:$0xff] (!%p761_p6)  ;;  %v920_v15 = vmov (!%p761_p6), 0   ;;  %v569_v17 = vld [vmem:[#allocation3 + $0x8] sm:$0xff] (!%p761_p6) }
 0x3b9   : > { %561 = sbr.rel (%p761_p6) target bundleno = 1107 (0x453), region = 44  ;;  %v562_v14 = vld [vmem:[#allocation4] sm:$0xff] (!%p761_p6)  ;;  %877 = vset.pattern.permute.xlu0 (!%p761_p6), %v920_v15  ;;  %878 = vset.pattern.permute.xlu1 (!%p761_p6), %v920_v15 }
 0x3ba   : > { %879 = vrcp.f32 (!%p761_p6), %v562_v14  ;;  %572 = vperm.xlu0 (!%p761_p6), %877, %v568_v13  }
 0x3bd   : > { %v563_v16 = vld [vmem:[#allocation4 + $0x8] sm:$0xff] (!%p761_p6) }
 0x3be   : > { %881 = vrcp.f32 (!%p761_p6), %v563_v16  ;;  %577 = vperm.xlu0 (!%p761_p6), %877, %v569_v17  }
 0x3c4   : > { %v880_v18 = vpop.eup %879 }
 0x3c5   : > { %594 = vperm.xlu1 %878, %v880_v18  }
 0x3c8   : > { %v882_v19 = vpop.eup %881 }
 0x3c9   : > { %599 = vperm.xlu1 %878, %v882_v19  }
 0x439   : > { %v573_v20 = vpop.permute.xlu0 %572 }
 0x43a   : > { %v580_v21 = vsub.f32 %v1037_v34, %v573_v20  ;;  %v581_v22 = vsub.f32 %v1039_v35, %v573_v20 }
 0x43c   : > { %v584_v23 = vmul.f32 1.442695, %v580_v21  ;;  %v586_v24 = vmul.f32 1.442695, %v581_v22 }
 0x43d   : > { %v578_v25 = vpop.permute.xlu0 %577 }
 0x43e   : > { %883 = vpow2.f32 %v584_v23  ;;  %v582_v26 = vsub.f32 %v1041_v36, %v578_v25  ;;  %v583_v27 = vsub.f32 %v1043_v37, %v578_v25 }
 0x43f   : > { %885 = vpow2.f32 %v586_v24 }
 0x440   : > { %v588_v28 = vmul.f32 1.442695, %v582_v26  ;;  %v590_v29 = vmul.f32 1.442695, %v583_v27 }
 0x442   : > { %887 = vpow2.f32 %v588_v28 }
 0x443   : > { %889 = vpow2.f32 %v590_v29 }
 0x444   : > { %v595_v30 = vpop.permute.xlu1 %594 }
 0x448   : > { %v884_v31 = vpop.eup %883  ;;  %v600_v39 = vpop.permute.xlu1 %599 }
 0x449   : > { %v886_v32 = vpop.eup %885  ;;  %v602_v33 = vmul.f32 %v884_v31, %v595_v30 }
 0x44a   : > { %v603_v34 = vmul.f32 %v886_v32, %v595_v30 }
 0x44c   : > { %v888_v38 = vpop.eup %887  ;;  %v769_v35 = vpack.c.bf16 %v603_v34, %v602_v33 }
 0x44d   : > { %v890_v40 = vpop.eup %889  ;;  %v604_v41 = vmul.f32 %v888_v38, %v600_v39 }
 0x44e   : > { %618 = vst [vmem:[%s1081_s3] sm:$0xff] %v769_v35  ;;  %v605_v36 = vmul.f32 %v890_v40, %v600_v39 }
 0x450   : > { %v770_v37 = vpack.c.bf16 %v605_v36, %v604_v41 }
 0x452   : > { %619 = vst [vmem:[%s1081_s3 + $0x8] sm:$0xff] %v770_v37 }
 0x453 PF: > { %s13_s14 = sadd.s32 1, %s913_s14   ;;  %s1082_s12 = smov %s909_s13 }
 0x454   : > { %p10_p7 = scmp.ge.s32.totalorder %s13_s14, 4   ;;  %s1083_s13 = smov %s1085_s15 }
 0x456   :  { %12 = sbr.rel (!%p10_p7) target bundleno = 2 (0x2), region = 77 }

// kernel: cbow_forward.1
= control target key start
LH: loop header
LB: loop body
LE: loop exit
PB: predicated region body
PF: predicated region fallthrough
CT: control target
= control target key end

     0   :  { %s941_s12 = smov 0   ;;  %s943_s13 = smov 0   ;;  %s1078_s0 = inlined_call_operand.vmem [shape: bf16[16,128], index: 0, kind: input, shape index: {}]   ;;  %s1079_s1 = inlined_call_operand.vmem [shape: bf16[128,128], index: 1, kind: input, shape index: {}]   ;;  %s1080_s2 = inlined_call_operand.vmem [shape: bf16[128,256], index: 2, kind: input, shape index: {}]   ;;  %s1081_s3 = inlined_call_operand.vmem [shape: bf16[16,256], index: 3, kind: output, shape index: {}]  }
   0x1   :  { %s945_s14 = smov 0  }
   0x2 LB: > { %s28_s15 = sadd.s32 1, %s909_s13  ;;  %p733_p0 = scmp.ge.s32.totalorder %s913_s14, 1  ;;  %s913_s14 = sphi %s945_s14, %s13_s14   ;;  %s909_s13 = sphi %s943_s13, %s1083_s13   ;;  %s905_s12 = sphi %s941_s12, %s1082_s12  }
   0x3   : > { %p30_p1 = scmp.ge.s32.totalorder %s28_s15, 2  ;;  %p172_p2 = scmp.lt.s32.totalorder %s913_s14, 3 }
   0x5   : > { %s1085_s15 = smov (%p30_p1, %s28_s15), 0  ;;  %p173_p3 = pnand %p733_p0, %p172_p2 }
   0x6   : > { %p234_p4 = scmp.eq.s32.totalorder (!%p173_p3), %s905_s12, 0 }
   0x7   : > { %176 = sbr.rel (%p173_p3) target bundleno = 1107 (0x453), region = 32 }
   0xe   : > { %239 = sbr.rel (!%p234_p4) target bundleno = 264 (0x108), region = 36  ;;  %vm355_vm0 = vcmask (%p234_p4), 7168   ;;  %v830_v0 = vld [vmem:[%s1079_s1] sm:$0xff] (%p234_p4)   ;;  %v915_v1 = vmov (%p234_p4), 0.0   ;;  %v916_v2 = vmov (%p234_p4), -inf   ;;  %v831_v3 = vld [vmem:[%s1079_s1 + $0x8] sm:$0xff] (%p234_p4)  }
   0xf   : > { %780 = vmatprep.subr.bf16.mxu0 (%p234_p4), %v915_v1  ;;  %356 = vst.msk [vmem:[#allocation3] sm:$0xff] (%p234_p4), %vm355_vm0, %v916_v2  ;;  %357 = vst.msk [vmem:[#allocation3 + $0x8] sm:$0xff] (%p234_p4), %vm355_vm0, %v916_v2  ;;  %vm917_vm1 = vmmov (%p234_p4), 0   ;;  %v832_v4 = vld [vmem:[%s1079_s1 + $0x10] sm:$0xff] (%p234_p4)   ;;  %v833_v5 = vld [vmem:[%s1079_s1 + $0x18] sm:$0xff] (%p234_p4)  }
  0x10   : > { %358 = vst.msk [vmem:[#allocation4] sm:$0xff] (%p234_p4), %vm355_vm0, %v915_v1  ;;  %359 = vst.msk [vmem:[#allocation4 + $0x8] sm:$0xff] (%p234_p4), %vm355_vm0, %v915_v1  ;;  %781 = vmatpush3.bf16.msra.mxu0 (%p234_p4), %v830_v0  ;;  %796 = vmatprep.mubr.msk.bf16.mxu0 (%p234_p4), %vm917_vm1, %v915_v1  ;;  %v834_v6 = vld [vmem:[%s1079_s1 + $0x20] sm:$0xff] (%p234_p4)   ;;  %v835_v7 = vld [vmem:[%s1079_s1 + $0x28] sm:$0xff] (%p234_p4)  }
  0x11   : > { %782 = vmatprep.subr.bf16.mxu0 (%p234_p4), %v915_v1  ;;  %v836_v8 = vld [vmem:[%s1079_s1 + $0x30] sm:$0xff] (%p234_p4)   ;;  %v837_v9 = vld [vmem:[%s1079_s1 + $0x38] sm:$0xff] (%p234_p4)   ;;  %v838_v10 = vld [vmem:[%s1078_s0] sm:$0xff] (%p234_p4)  }
  0x14   : > { %783 = vmatpush3.bf16.msra.mxu0 (%p234_p4), %v831_v3 }
  0x15   : > { %784 = vmatprep.subr.bf16.mxu0 %v915_v1 }
  0x18   : > { %785 = vmatpush3.bf16.msra.mxu0 %v832_v4 }
  0x19   : > { %786 = vmatprep.subr.bf16.mxu0 %v915_v1 }
  0x1c   : > { %787 = vmatpush3.bf16.msra.mxu0 %v833_v5 }
  0x1d   : > { %788 = vmatprep.subr.bf16.mxu0 %v915_v1 }
  0x20   : > { %789 = vmatpush3.bf16.msra.mxu0 %v834_v6 }
  0x21   : > { %790 = vmatprep.subr.bf16.mxu0 %v915_v1 }
  0x24   : > { %791 = vmatpush3.bf16.msra.mxu0 %v835_v7 }
  0x25   : > { %792 = vmatprep.subr.bf16.mxu0 %v915_v1 }
  0x28   : > { %793 = vmatpush3.bf16.msra.mxu0 %v836_v8 }
  0x29   : > { %794 = vmatprep.subr.bf16.mxu0 %v915_v1 }
  0x2c   : > { %795 = vmatpush3.bf16.msra.mxu0 %v837_v9 }
  0x2f   : > { %797 = vmatmul.mubr.bf16.vlgmr.msra.gmra.mrb[0].mxu0 %v838_v10 }
 0x102   : > { %v346_v11 = vpop.f32.mrb[0].mxu0 }
 0x103   : > { %v798_v12 = vpop.f32.mrb[1].mxu0 }
 0x104   : > { %v349_v13 = vpop.f32.mrb[2].mxu0 }
 0x105   : > { %v353_v14 = vpack.c.bf16 %v349_v13, %v346_v11  ;;  %v799_v15 = vpop.f32.mrb[3].mxu0 }
 0x107   : > { %354 = vst [vmem:[#allocation2] sm:$0xff] %v353_v14 }
 0x108 PF: > { %v839_v16 = vld [vmem:[%s1080_s2 + $0x4] ss:$8 sps:$4 sm:$0xff]   ;;  %v841_v17 = vld [vmem:[%s1080_s2] ss:$8 sps:$4 sm:$0xff]   ;;  %v918_v18 = vmov 0   ;;  %p760_p5 = scmp.ne.s32.totalorder %s905_s12, 0 }
 0x109   : > { %489 = vmatprep.mubr.bf16.mxu0 %v918_v18  ;;  %457 = vmatprep.subr.bf16.mxu0 %v839_v16  ;;  %v842_v19 = vld [vmem:[%s1080_s2 + $0x14] ss:$8 sps:$4 sm:$0xff]   ;;  %v844_v20 = vld [vmem:[%s1080_s2 + $0x10] ss:$8 sps:$4 sm:$0xff]   ;;  %v845_v21 = vld [vmem:[%s1080_s2 + $0x24] ss:$8 sps:$4 sm:$0xff]  }
 0x10a   : > { %458 = vmatpush1.bf16.msra.mxu0 %v841_v17  ;;  %v847_v22 = vld [vmem:[%s1080_s2 + $0x20] ss:$8 sps:$4 sm:$0xff]   ;;  %v848_v23 = vld [vmem:[%s1080_s2 + $0x34] ss:$8 sps:$4 sm:$0xff]   ;;  %v850_v24 = vld [vmem:[%s1080_s2 + $0x30] ss:$8 sps:$4 sm:$0xff]  }
 0x10b   : > { %459 = vmatprep.subr.bf16.mxu0 %v842_v19  ;;  %v851_v25 = vld [vmem:[%s1080_s2 + $0x44] ss:$8 sps:$4 sm:$0xff]   ;;  %v853_v26 = vld [vmem:[%s1080_s2 + $0x40] ss:$8 sps:$4 sm:$0xff]   ;;  %v854_v27 = vld [vmem:[%s1080_s2 + $0x54] ss:$8 sps:$4 sm:$0xff]  }
 0x10c   : > { %v856_v28 = vld [vmem:[%s1080_s2 + $0x50] ss:$8 sps:$4 sm:$0xff]   ;;  %v857_v29 = vld [vmem:[%s1080_s2 + $0x64] ss:$8 sps:$4 sm:$0xff]   ;;  %v859_v30 = vld [vmem:[%s1080_s2 + $0x60] ss:$8 sps:$4 sm:$0xff]  }
 0x10d   : > { %v860_v31 = vld [vmem:[%s1080_s2 + $0x74] ss:$8 sps:$4 sm:$0xff]   ;;  %v862_v32 = vld [vmem:[%s1080_s2 + $0x70] ss:$8 sps:$4 sm:$0xff]   ;;  %v919_v40 = vmov (!%p760_p5), 0   ;;  %v503_v41 = vld [vmem:[#allocation3] sm:$0xff] (!%p760_p5) }
 0x10e   : > { %460 = vmatpush1.bf16.msra.mxu0 %v844_v20  ;;  %v360_v33 = vld [vmem:[#allocation2] sm:$0xff]  ;;  %863 = vset.pattern.permute.xlu1 (!%p760_p5), %v919_v40  ;;  %vm553_vm2 = vcmask (!%p760_p5), 7168   ;;  %v504_v44 = vld [vmem:[#allocation3 + $0x8] sm:$0xff] (!%p760_p5)  ;;  %v513_v4 = vld [vmem:[#allocation4] sm:$0xff] (!%p760_p5) }
 0x10f   : > { %461 = vmatprep.subr.bf16.mxu0 %v845_v21  ;;  %864 = vset.pattern.permute.xlu0 (!%p760_p5), %v919_v40  ;;  %v514_v8 = vld [vmem:[#allocation4 + $0x8] sm:$0xff] (!%p760_p5) }
 0x112   : > { %462 = vmatpush1.bf16.msra.mxu0 %v847_v22 }
 0x113   : > { %463 = vmatprep.subr.bf16.mxu0 %v848_v23 }
 0x116   : > { %464 = vmatpush1.bf16.msra.mxu0 %v850_v24 }
 0x117   : > { %465 = vmatprep.subr.bf16.mxu0 %v851_v25 }
 0x11a   : > { %466 = vmatpush1.bf16.msra.mxu0 %v853_v26 }
 0x11b   : > { %467 = vmatprep.subr.bf16.mxu0 %v854_v27 }
 0x11e   : > { %468 = vmatpush1.bf16.msra.mxu0 %v856_v28 }
 0x11f   : > { %469 = vmatprep.subr.bf16.mxu0 %v857_v29 }
 0x122   : > { %470 = vmatpush1.bf16.msra.mxu0 %v859_v30 }
 0x123   : > { %471 = vmatprep.subr.bf16.mxu0 %v860_v31 }
 0x126   : > { %472 = vmatpush1.bf16.msra.mxu0 %v862_v32 }
 0x129   : > { %490 = vmatmul.mubr.bf16.vlgmr.msra.gmra.mrb[0].mxu0 %v360_v33 }
 0x1f9   : > { %502 = sbr.rel (%p760_p5) target bundleno = 951 (0x3b7), region = 40 }
 0x1fc   : > { %v1037_v34 = vpop.f32.mrb[0].mxu0 }
 0x1fd   : > { %v1039_v35 = vpop.f32.mrb[1].mxu0 }
 0x1fe   : > { %v1041_v36 = vpop.f32.mrb[2].mxu0  ;;  %v505_v38 = vmax.f32 (!%p760_p5), %v1037_v34, %v1039_v35 }
 0x1ff   : > { %v1043_v37 = vpop.f32.mrb[3].mxu0 }
 0x200   : > { %506 = vmax.xlane.f32.xlu0 %v505_v38  ;;  %v508_v39 = vmax.f32 %v1041_v36, %v1043_v37 }
 0x204   : > { %509 = vmax.xlane.f32.xlu0 %v508_v39 }
 0x28d   : > { %v507_v42 = vpop.xlane.xlu0 %506 }
 0x28e   : > { %v511_v43 = vmax.f32 %v503_v41, %v507_v42 }
 0x290   : > { %v515_v45 = vsub.f32 %v503_v41, %v511_v43  ;;  %556 = vst.msk [vmem:[#allocation3] sm:$0xff] %vm553_vm2, %v511_v43  ;;  %525 = vperm.xlu1 %863, %v511_v43  }
 0x291   : > { %v510_v46 = vpop.xlane.xlu0 %509 }
 0x292   : > { %v512_v47 = vmax.f32 %v504_v44, %v510_v46  ;;  %v517_v1 = vmul.f32 1.442695, %v515_v45 }
 0x294   : > { %v516_v48 = vsub.f32 %v504_v44, %v512_v47  ;;  %557 = vst.msk [vmem:[#allocation3 + $0x8] sm:$0xff] %vm553_vm2, %v512_v47  ;;  %530 = vperm.xlu1 %863, %v512_v47  }
 0x296   : > { %v519_v2 = vmul.f32 1.442695, %v516_v48 }
 0x30f   : > { %v526_v49 = vpop.permute.xlu1 %525 }
 0x310   : > { %v533_v50 = vsub.f32 %v1037_v34, %v526_v49  ;;  %v534_v51 = vsub.f32 %v1039_v35, %v526_v49 }
 0x312   : > { %v537_v52 = vmul.f32 1.442695, %v533_v50  ;;  %v539_v53 = vmul.f32 1.442695, %v534_v51 }
 0x313   : > { %v531_v54 = vpop.permute.xlu1 %530 }
 0x314   : > { %865 = vpow2.f32 %v537_v52  ;;  %v535_v55 = vsub.f32 %v1041_v36, %v531_v54  ;;  %v536_v56 = vsub.f32 %v1043_v37, %v531_v54 }
 0x315   : > { %867 = vpow2.f32 %v539_v53 }
 0x316   : > { %v541_v57 = vmul.f32 1.442695, %v535_v55  ;;  %v543_v58 = vmul.f32 1.442695, %v536_v56 }
 0x318   : > { %869 = vpow2.f32 %v541_v57 }
 0x319   : > { %871 = vpow2.f32 %v543_v58 }
 0x31a   : > { %873 = vpow2.f32 %v517_v1 }
 0x31b   : > { %875 = vpow2.f32 %v519_v2 }
 0x31e   : > { %v866_v59 = vpop.eup %865 }
 0x31f   : > { %v868_v60 = vpop.eup %867 }
 0x320   : > { %v545_v61 = vadd.f32 %v868_v60, %v866_v59 }
 0x322   : > { %v870_v62 = vpop.eup %869  ;;  %546 = vadd.xlane.f32.xlu0 %v545_v61 }
 0x323   : > { %v872_v63 = vpop.eup %871 }
 0x324   : > { %v548_v0 = vadd.f32 %v872_v63, %v870_v62  ;;  %v874_v3 = vpop.eup %873 }
 0x325   : > { %v521_v5 = vmul.f32 %v874_v3, %v513_v4  ;;  %v876_v6 = vpop.eup %875 }
 0x326   : > { %549 = vadd.xlane.f32.xlu1 %v548_v0  ;;  %v522_v10 = vmul.f32 %v876_v6, %v514_v8 }
 0x3af   : > { %v547_v7 = vpop.xlane.xlu0 %546 }
 0x3b0   : > { %v551_v9 = vadd.f32 %v547_v7, %v521_v5 }
 0x3b2   : > { %554 = vst.msk [vmem:[#allocation4] sm:$0xff] %vm553_vm2, %v551_v9 }
 0x3b3   : > { %v550_v11 = vpop.xlane.xlu1 %549 }
 0x3b4   : > { %v552_v12 = vadd.f32 %v550_v11, %v522_v10 }
 0x3b6   : > { %555 = vst.msk [vmem:[#allocation4 + $0x8] sm:$0xff] %vm553_vm2, %v552_v12 }
 0x3b7 PF: > { %p761_p6 = scmp.ne.s32.totalorder %s905_s12, 1 }
 0x3b8   : > { %v568_v13 = vld [vmem:[#allocation3] sm:$0xff] (!%p761_p6)  ;;  %v920_v15 = vmov (!%p761_p6), 0   ;;  %v569_v17 = vld [vmem:[#allocation3 + $0x8] sm:$0xff] (!%p761_p6) }
 0x3b9   : > { %561 = sbr.rel (%p761_p6) target bundleno = 1107 (0x453), region = 44  ;;  %v562_v14 = vld [vmem:[#allocation4] sm:$0xff] (!%p761_p6)  ;;  %877 = vset.pattern.permute.xlu0 (!%p761_p6), %v920_v15  ;;  %878 = vset.pattern.permute.xlu1 (!%p761_p6), %v920_v15 }
 0x3ba   : > { %879 = vrcp.f32 (!%p761_p6), %v562_v14  ;;  %572 = vperm.xlu0 (!%p761_p6), %877, %v568_v13  }
 0x3bd   : > { %v563_v16 = vld [vmem:[#allocation4 + $0x8] sm:$0xff] (!%p761_p6) }
 0x3be   : > { %881 = vrcp.f32 (!%p761_p6), %v563_v16  ;;  %577 = vperm.xlu0 (!%p761_p6), %877, %v569_v17  }
 0x3c4   : > { %v880_v18 = vpop.eup %879 }
 0x3c5   : > { %594 = vperm.xlu1 %878, %v880_v18  }
 0x3c8   : > { %v882_v19 = vpop.eup %881 }
 0x3c9   : > { %599 = vperm.xlu1 %878, %v882_v19  }
 0x439   : > { %v573_v20 = vpop.permute.xlu0 %572 }
 0x43a   : > { %v580_v21 = vsub.f32 %v1037_v34, %v573_v20  ;;  %v581_v22 = vsub.f32 %v1039_v35, %v573_v20 }
 0x43c   : > { %v584_v23 = vmul.f32 1.442695, %v580_v21  ;;  %v586_v24 = vmul.f32 1.442695, %v581_v22 }
 0x43d   : > { %v578_v25 = vpop.permute.xlu0 %577 }
 0x43e   : > { %883 = vpow2.f32 %v584_v23  ;;  %v582_v26 = vsub.f32 %v1041_v36, %v578_v25  ;;  %v583_v27 = vsub.f32 %v1043_v37, %v578_v25 }
 0x43f   : > { %885 = vpow2.f32 %v586_v24 }
 0x440   : > { %v588_v28 = vmul.f32 1.442695, %v582_v26  ;;  %v590_v29 = vmul.f32 1.442695, %v583_v27 }
 0x442   : > { %887 = vpow2.f32 %v588_v28 }
 0x443   : > { %889 = vpow2.f32 %v590_v29 }
 0x444   : > { %v595_v30 = vpop.permute.xlu1 %594 }
 0x448   : > { %v884_v31 = vpop.eup %883  ;;  %v600_v39 = vpop.permute.xlu1 %599 }
 0x449   : > { %v886_v32 = vpop.eup %885  ;;  %v602_v33 = vmul.f32 %v884_v31, %v595_v30 }
 0x44a   : > { %v603_v34 = vmul.f32 %v886_v32, %v595_v30 }
 0x44c   : > { %v888_v38 = vpop.eup %887  ;;  %v769_v35 = vpack.c.bf16 %v603_v34, %v602_v33 }
 0x44d   : > { %v890_v40 = vpop.eup %889  ;;  %v604_v41 = vmul.f32 %v888_v38, %v600_v39 }
 0x44e   : > { %618 = vst [vmem:[%s1081_s3] sm:$0xff] %v769_v35  ;;  %v605_v36 = vmul.f32 %v890_v40, %v600_v39 }
 0x450   : > { %v770_v37 = vpack.c.bf16 %v605_v36, %v604_v41 }
 0x452   : > { %619 = vst [vmem:[%s1081_s3 + $0x8] sm:$0xff] %v770_v37 }
 0x453 PF: > { %s13_s14 = sadd.s32 1, %s913_s14   ;;  %s1082_s12 = smov %s909_s13 }
 0x454   : > { %p10_p7 = scmp.ge.s32.totalorder %s13_s14, 4   ;;  %s1083_s13 = smov %s1085_s15 }
 0x456   :  { %12 = sbr.rel (!%p10_p7) target bundleno = 2 (0x2), region = 77 }

</bundles_post_ra>
